<compile_context>
chip_gen: v6e
topology: v6e:2x2x1
jax: 0.10.0
libtpu: 0.0.40
codegen_flags: <defaults>
</compile_context>

<pallas_src>
import jax
import jax.numpy as jnp
from jax import lax
from jax.experimental import pallas as pl
from jax.experimental.pallas import tpu as pltpu


# ----------------------------------------------------------------------------
# Helpers
# ----------------------------------------------------------------------------
def _round_up(x, m):
    return ((x + m - 1) // m) * m


def _vmem_limit_bytes():
    """Generation-aware scoped-VMEM cap."""
    try:
        cap = pltpu.get_tpu_info().vmem_capacity_bytes
    except Exception:
        cap = 64 * 1024 * 1024
    if cap >= 100 * 1024 * 1024:      # v5e / v6e: 128 MiB physical
        return 100 * 1024 * 1024
    return 40 * 1024 * 1024           # v7x: 64 MiB physical, leave headroom


_VMEM_LIMIT = _vmem_limit_bytes()

# Largest extent taken as a single (un-tiled) block along Nout / K of a linear.
_FULL_N_CAP = 2304    # covers ViT-Base qkv (3*768); larger Nout is tiled+padded
_FULL_K_CAP = 1024


def _choose_tile(dim, preferred, align, full_cap=0):
    """Return (tile, padded_dim): tile is a multiple of `align`, padded_dim a
    multiple of tile.  Takes the whole (aligned) extent when small enough,
    otherwise tiles at `preferred` and pads the array up to a multiple, so the
    tile never silently collapses for awkward dims."""
    preferred = max(_round_up(preferred, align), align)
    full_cap = max(full_cap, preferred)
    aligned = _round_up(dim, align)
    if aligned <= full_cap:
        return aligned, aligned
    return preferred, _round_up(dim, preferred)


# ----------------------------------------------------------------------------
# Tiled linear (x @ w + b) kernel
# ----------------------------------------------------------------------------
def linear_kernel(x_ref, w_ref, b_ref, o_ref, acc_ref):
    k = pl.program_id(2)

    @pl.when(k == 0)
    def _():
        acc_ref[...] = jnp.zeros_like(acc_ref)

    acc_ref[...] += jnp.dot(x_ref[...], w_ref[...],
                            preferred_element_type=jnp.float32)

    @pl.when(k == pl.num_programs(2) - 1)
    def _():
        o_ref[...] = (acc_ref[...] + b_ref[...]).astype(o_ref.dtype)


def pallas_linear(x2d, w, b, *, out_dtype=None, tm=1024, tn=1024, tk=512):
    """(M, K) @ (K, Nout) + (Nout,) -> (M, Nout) in out_dtype.

    Inputs are zero-padded to tile multiples (pad rows/cols contribute zero and
    are sliced off the output) so tiles stay large regardless of divisibility.
    """
    M, K = x2d.shape
    Kw, Nout = w.shape
    assert K == Kw
    out_dtype = out_dtype or x2d.dtype

    align_m = 16 if jnp.dtype(x2d.dtype).itemsize == 2 else 8  # bf16 native (16,128)
    tm, Mp = _choose_tile(M, tm, align_m)
    tn, Np = _choose_tile(Nout, tn, 128, full_cap=_FULL_N_CAP)
    tk, Kp = _choose_tile(K, tk, 128, full_cap=_FULL_K_CAP)

    if (Mp, Kp) != (M, K):
        x2d = jnp.pad(x2d, ((0, Mp - M), (0, Kp - K)))
    if (Kp, Np) != (K, Nout):
        w = jnp.pad(w, ((0, Kp - K), (0, Np - Nout)))
    b2d = b.reshape(1, Nout).astype(jnp.float32)
    if Np != Nout:
        b2d = jnp.pad(b2d, ((0, 0), (0, Np - Nout)))

    in_bytes = jnp.dtype(x2d.dtype).itemsize
    out_bytes = jnp.dtype(out_dtype).itemsize
    cost = pl.CostEstimate(
        flops=2 * M * K * Nout,
        transcendentals=0,
        bytes_accessed=(M * K + K * Nout) * in_bytes
        + M * Nout * out_bytes + Nout * 4,
    )

    out = pl.pallas_call(
        linear_kernel,
        out_shape=jax.ShapeDtypeStruct((Mp, Np), out_dtype),
        grid=(Mp // tm, Np // tn, Kp // tk),
        in_specs=[
            pl.BlockSpec((tm, tk), lambda i, j, k: (i, k)),
            pl.BlockSpec((tk, tn), lambda i, j, k: (k, j)),
            pl.BlockSpec((1, tn), lambda i, j, k: (0, j)),
        ],
        out_specs=pl.BlockSpec((tm, tn), lambda i, j, k: (i, j)),
        scratch_shapes=[pltpu.VMEM((tm, tn), jnp.float32)],
        compiler_params=pltpu.CompilerParams(
            dimension_semantics=("parallel", "parallel", "arbitrary"),
            vmem_limit_bytes=_VMEM_LIMIT,
        ),
        cost_estimate=cost,
    )(x2d, w, b2d)

    if (Mp, Np) != (M, Nout):
        out = out[:M, :Nout]
    return out


# ----------------------------------------------------------------------------
# Attention core
# ----------------------------------------------------------------------------
def _attn_heads(q, k, v, bias, o_ref, heads, head_dim, approx_recip):
    """q/k/v: (N, heads*head_dim) head-major slabs; bias: (1, N) additive f32.
    Softmax scale is pre-folded into the q projection weights."""
    outs = []
    for h in range(heads):                                     # static unroll
        sl = slice(h * head_dim, (h + 1) * head_dim)
        qh, kh, vh = q[:, sl], k[:, sl], v[:, sl]              # (N, D) each
        # scores = q @ k^T: contract D of both -> transposed-RHS MXU pass,
        # no in-kernel transpose of the k tile.
        s = lax.dot_general(qh, kh, (((1,), (1,)), ((), ())),
                            preferred_element_type=jnp.float32)      # (N, N)
        s = s + bias
        s = s - jnp.max(s, axis=-1, keepdims=True)             # stable softmax
        e = jnp.exp(s)
        p = e * pl.reciprocal(jnp.sum(e, axis=-1, keepdims=True),
                              approx=approx_recip)
        oh = jnp.dot(p.astype(vh.dtype), vh, preferred_element_type=jnp.float32)
        outs.append(oh.astype(o_ref.dtype))                    # cast BEFORE concat
    # single lane-dense (N, heads*D) store, already in (B, N, H*D) layout
    o_ref[0] = jnp.concatenate(outs, axis=-1)


def make_attn_kernel_fused(num_heads, head_dim, approx_recip):
    C = num_heads * head_dim

    def kernel(qkv_ref, mask_ref, o_ref):
        qkv = qkv_ref[0]                                       # (N, 3C), one DMA
        _attn_heads(qkv[:, 0:C], qkv[:, C:2 * C], qkv[:, 2 * C:3 * C],
                    mask_ref[...], o_ref, num_heads, head_dim, approx_recip)
    return kernel


def make_attn_kernel_grouped(heads_per_group, head_dim, approx_recip):
    def kernel(q_ref, k_ref, v_ref, mask_ref, o_ref):
        _attn_heads(q_ref[0], k_ref[0], v_ref[0], mask_ref[...], o_ref,
                    heads_per_group, head_dim, approx_recip)
    return kernel


def pallas_attention_core(qkv, mask_bias, num_heads, *, out_dtype,
                          head_groups=None):
    """qkv: (B, N, 3C) fused activation (softmax scale pre-folded into the q
    columns); mask_bias: (B, N) additive f32 -> (B, N, C)."""
    B, N, C3 = qkv.shape
    C = C3 // 3
    D = C // num_heads
    approx_recip = qkv.dtype == jnp.bfloat16

    if head_groups is None:
        # Two head-groups feed both v7x TensorCores at small B and halve the
        # per-step live f32 scores, while keeping stores lane-dense
        # (requires C/2 to be a 128-multiple; e.g. C=768 -> 384).
        head_groups = 2 if (num_heads % 2 == 0 and (C // 2) % 128 == 0) else 1
    G = head_groups
    Cg = C // G

    itemsize = jnp.dtype(qkv.dtype).itemsize
    cost = pl.CostEstimate(
        flops=4 * B * num_heads * N * N * D + 6 * B * num_heads * N * N,
        transcendentals=B * num_heads * N * N,
        bytes_accessed=B * N * 3 * C * itemsize
        + B * N * C * jnp.dtype(out_dtype).itemsize + B * N * 4,
    )
    cparams = pltpu.CompilerParams(
        dimension_semantics=("parallel",) if G == 1 else ("parallel", "parallel"),
        vmem_limit_bytes=_VMEM_LIMIT,
    )

    if G == 1:
        kernel = make_attn_kernel_fused(num_heads, D, approx_recip)
        return pl.pallas_call(
            kernel,
            out_shape=jax.ShapeDtypeStruct((B, N, C), out_dtype),
            grid=(B,),
            in_specs=[
                pl.BlockSpec((1, N, 3 * C), lambda b: (b, 0, 0)),  # fused qkv DMA
                pl.BlockSpec((1, N), lambda b: (b, 0)),            # mask row
            ],
            out_specs=pl.BlockSpec((1, N, C), lambda b: (b, 0, 0)),
            compiler_params=cparams,
            cost_estimate=cost,
        )(qkv, mask_bias)

    kernel = make_attn_kernel_grouped(num_heads // G, D, approx_recip)
    return pl.pallas_call(
        kernel,
        out_shape=jax.ShapeDtypeStruct((B, N, C), out_dtype),
        grid=(B, G),
        in_specs=[
            pl.BlockSpec((1, N, Cg), lambda b, g: (b, 0, g)),          # q group
            pl.BlockSpec((1, N, Cg), lambda b, g: (b, 0, G + g)),      # k group
            pl.BlockSpec((1, N, Cg), lambda b, g: (b, 0, 2 * G + g)),  # v group
            pl.BlockSpec((1, N), lambda b, g: (b, 0)),                 # mask row
        ],
        out_specs=pl.BlockSpec((1, N, Cg), lambda b, g: (b, 0, g)),
        compiler_params=cparams,
        cost_estimate=cost,
    )(qkv, qkv, qkv, mask_bias)


# ----------------------------------------------------------------------------
# Full forward pass
# ----------------------------------------------------------------------------
def attention_forward(x, mask, params, num_heads, compute_dtype=jnp.bfloat16,
                      out_dtype=jnp.float32):
    """Pallas implementation of the PyTorch Attention.forward.
    attn_drop / proj_drop have p = 0.0 -> identity."""
    B, N, C = x.shape
    H = num_heads
    D = C // H
    scale = D ** (-0.5)
    cd = compute_dtype

    # Fold the softmax scale into the q columns of the qkv projection; removes
    # the per-element `* scale` from the attention kernel's VPU epilogue.
    w_qkv = params["w_qkv"].astype(jnp.float32).at[:, :C].multiply(scale)
    b_qkv = params["b_qkv"].astype(jnp.float32).at[:C].multiply(scale)

    # --- fused QKV projection (bf16 MXU inputs, f32 accumulation) ------------
    x2d = x.reshape(B * N, C).astype(cd)
    qkv = pallas_linear(x2d, w_qkv.astype(cd), b_qkv, out_dtype=cd)  # (B*N, 3C)
    qkv = qkv.reshape(B, N, 3 * C)                                   # free reshape

    # --- additive mask bias: (1 - mask) * -10000 ------------------------------
    if mask is None:
        mask_bias = jnp.zeros((B, N), dtype=jnp.float32)
    else:
        mask_bias = (1.0 - mask.astype(jnp.float32)) * -10000.0

    # --- attention core (output already in (B, N, H*D) = (B, N, C) layout) ----
    o = pallas_attention_core(qkv, mask_bias, H, out_dtype=cd)

    # --- output projection -----------------------------------------------------
    # TODO(synk): pass out_dtype=compute_dtype (bf16) when the caller accepts it
    # to halve the HBM writeback of the (B*N, C) result.
    out = pallas_linear(o.reshape(B * N, C), params["w_proj"].astype(cd),
                        params["b_proj"].astype(jnp.float32), out_dtype=out_dtype)
    return out.reshape(B, N, C)


# ----------------------------------------------------------------------------
# Plain-JAX reference (for correctness check)
# ----------------------------------------------------------------------------
def attention_reference(x, mask, params, num_heads):
    B, N, C = x.shape
    H = num_heads
    D = C // H
    scale = D ** (-0.5)
    qkv = x @ params["w_qkv"] + params["b_qkv"]
    qkv = qkv.reshape(B, N, 3, H, D).transpose(2, 0, 3, 1, 4)
    q, k, v = qkv[0], qkv[1], qkv[2]
    attn = jnp.einsum("bhnd,bhmd->bhnm", q, k) * scale
    if mask is not None:
        attn = attn + (1.0 - mask.astype(jnp.float32))[:, None, None, :] * -10000.0
    attn = jax.nn.softmax(attn, axis=-1)
    o = jnp.einsum("bhnm,bhmd->bhnd", attn, v)
    o = o.transpose(0, 2, 1, 3).reshape(B, N, C)
    return o @ params["w_proj"] + params["b_proj"]


def _make_params(key, C, qkv_bias):
    k_qkv, k_qb, k_proj, k_pb = jax.random.split(key, 4)
    return {
        "w_qkv": jax.random.normal(k_qkv, (C, 3 * C), dtype=jnp.float32) * 0.02,
        "b_qkv": (jax.random.normal(k_qb, (3 * C,), dtype=jnp.float32) * 0.02
                  if qkv_bias else jnp.zeros((3 * C,), dtype=jnp.float32)),
        "w_proj": jax.random.normal(k_proj, (C, C), dtype=jnp.float32) * 0.02,
        "b_proj": jax.random.normal(k_pb, (C,), dtype=jnp.float32) * 0.02,
    }


# ----------------------------------------------------------------------------
if __name__ == "__main__":
    key = jax.random.PRNGKey(0)
    k_lin, k_sm, k_md = jax.random.split(key, 3)

    # --- standalone tiled-linear check: exercises M grid (tm=16 over M=44->48),
    # K accumulation (tk=256 over K=2000->2048) and the Nout padding (200->256).
    k_xt, k_wt, k_bt = jax.random.split(k_lin, 3)
    xt = jax.random.normal(k_xt, (44, 2000), dtype=jnp.float32)
    wt = jax.random.normal(k_wt, (2000, 200), dtype=jnp.float32) * 0.02
    bt = jax.random.normal(k_bt, (200,), dtype=jnp.float32) * 0.02
    yt = jax.block_until_ready(
        pallas_linear(xt, wt, bt, out_dtype=jnp.float32, tm=16, tn=128, tk=256))
    assert yt.shape == (44, 200)
    assert jnp.allclose(yt, xt @ wt + bt, atol=5e-3, rtol=5e-3), "linear mismatch"

    # --- small-shape attention check (fused single-group path) ---------------
    B, N, C, H = 2, 8, 32, 8     # head_dim = 4
    k_x, k_p, k_m = jax.random.split(k_sm, 3)
    x = jax.random.normal(k_x, (B, N, C), dtype=jnp.float32)
    params = _make_params(k_p, C, qkv_bias=False)
    mask = (jax.random.uniform(k_m, (B, N)) > 0.25).astype(jnp.float32)
    mask = mask.at[:, 0].set(1.0)

    ref = attention_reference(x, mask, params, num_heads=H)

    out_f32 = jax.block_until_ready(
        attention_forward(x, mask, params, H, compute_dtype=jnp.float32))
    assert out_f32.shape == (B, N, C)
    assert jnp.allclose(out_f32, ref, atol=2e-4, rtol=2e-4), "small f32 mismatch"

    out_bf16 = jax.block_until_ready(attention_forward(x, mask, params, H))
    assert out_bf16.shape == (B, N, C)
    assert jnp.allclose(out_bf16, ref, atol=2e-3, rtol=2e-2), "small bf16 mismatch"

    # --- ViT-Base-shaped check (N=197, C=768, H=12): exercises the M-padding
    # path (394 -> 400), full-extent tn=2304 linear tile and the two-head-group
    # attention grid (G=2, lane-dense (1, 197, 384) blocks). --------------------
    Bm, Nm, Cm, Hm = 2, 197, 768, 12
    k_x2, k_p2, k_m2 = jax.random.split(k_md, 3)
    xm = jax.random.normal(k_x2, (Bm, Nm, Cm), dtype=jnp.float32)
    params_m = _make_params(k_p2, Cm, qkv_bias=True)
    mask_m = (jax.random.uniform(k_m2, (Bm, Nm)) > 0.3).astype(jnp.float32)
    mask_m = mask_m.at[:, 0].set(1.0)

    ref_m = attention_reference(xm, mask_m, params_m, num_heads=Hm)
    out_m = jax.block_until_ready(attention_forward(xm, mask_m, params_m, Hm))
    assert out_m.shape == (Bm, Nm, Cm)
    assert jnp.allclose(out_m, ref_m, atol=5e-2, rtol=5e-2), "ViT-shape mismatch"

    print("KERNEL_OK")
</pallas_src>

<mosaic_0001>
module attributes {stable_mosaic.version = 11 : i64} {
  func.func @linear_kernel(%arg0: i32, %arg1: i32, %arg2: i32, %arg3: memref<16x256xf32, #tpu.memory_space<vmem>>, %arg4: memref<256x256xf32, #tpu.memory_space<vmem>>, %arg5: memref<1x256xf32, #tpu.memory_space<vmem>>, %arg6: memref<16x256xf32, #tpu.memory_space<vmem>>, %arg7: memref<16x256xf32, #tpu.memory_space<vmem>>) attributes {dimension_semantics = [#tpu.dimension_semantics<parallel>, #tpu.dimension_semantics<parallel>, #tpu.dimension_semantics<arbitrary>], iteration_bounds = array<i64: 3, 1, 8>, scalar_prefetch = 0 : i64, scratch_operands = 1 : i64, tpu.core_type = #tpu.core_type<tc>, window_params = [{transform_indices = @transform_0, window_bounds = array<i64: 16, 256>}, {transform_indices = @transform_1, window_bounds = array<i64: 256, 256>}, {transform_indices = @transform_2, window_bounds = array<i64: 1, 256>}, {transform_indices = @transform_3, window_bounds = array<i64: 16, 256>}]} {
    %c0_i32 = arith.constant 0 : i32
    %0 = arith.cmpi eq, %arg2, %c0_i32 : i32
    %1 = arith.extui %0 : i1 to i32
    %c0_i32_0 = arith.constant 0 : i32
    %2 = arith.cmpi ne, %1, %c0_i32_0 : i32
    scf.if %2 {
      %cst_9 = arith.constant 0.000000e+00 : f32
      %12 = vector.broadcast %cst_9 : f32 to vector<16x256xf32>
      %c0_10 = arith.constant 0 : index
      %c0_11 = arith.constant 0 : index
      %13 = vector.load %arg7[%c0_10, %c0_11] : memref<16x256xf32, #tpu.memory_space<vmem>>, vector<16x256xf32>
      tpu.vector_store %arg7[%c0_10, %c0_11], %12 {strides = array<i32>} : memref<16x256xf32, #tpu.memory_space<vmem>>, vector<16x256xf32>,
    } else {
    }
    %c0 = arith.constant 0 : index
    %c0_1 = arith.constant 0 : index
    %3 = vector.load %arg7[%c0, %c0_1] : memref<16x256xf32, #tpu.memory_space<vmem>>, vector<16x256xf32>
    %c0_2 = arith.constant 0 : index
    %c0_3 = arith.constant 0 : index
    %4 = vector.load %arg3[%c0_2, %c0_3] : memref<16x256xf32, #tpu.memory_space<vmem>>, vector<16x256xf32>
    %c0_4 = arith.constant 0 : index
    %c0_5 = arith.constant 0 : index
    %5 = vector.load %arg4[%c0_4, %c0_5] : memref<256x256xf32, #tpu.memory_space<vmem>>, vector<256x256xf32>
    %cst = arith.constant dense<0.000000e+00> : vector<16x256xf32>
    %6 = tpu.matmul %4, %5, %cst {dimension_numbers = #tpu.dot_dimension_numbers<[1], [0], [0], [1], [0, 0, 1, 1], [], []>} : vector<16x256xf32>, vector<256x256xf32>, vector<16x256xf32> -> vector<16x256xf32>
    %7 = arith.addf %3, %6 : vector<16x256xf32>
    %c0_6 = arith.constant 0 : index
    %c0_7 = arith.constant 0 : index
    %8 = vector.load %arg7[%c0_6, %c0_7] : memref<16x256xf32, #tpu.memory_space<vmem>>, vector<16x256xf32>
    tpu.vector_store %arg7[%c0_6, %c0_7], %7 {strides = array<i32>} : memref<16x256xf32, #tpu.memory_space<vmem>>, vector<16x256xf32>,
    %c7_i32 = arith.constant 7 : i32
    %9 = arith.cmpi eq, %arg2, %c7_i32 : i32
    %10 = arith.extui %9 : i1 to i32
    %c0_i32_8 = arith.constant 0 : i32
    %11 = arith.cmpi ne, %10, %c0_i32_8 : i32
    scf.if %11 {
      %c0_9 = arith.constant 0 : index
      %c0_10 = arith.constant 0 : index
      %12 = vector.load %arg7[%c0_9, %c0_10] : memref<16x256xf32, #tpu.memory_space<vmem>>, vector<16x256xf32>
      %c0_11 = arith.constant 0 : index
      %c0_12 = arith.constant 0 : index
      %13 = vector.load %arg5[%c0_11, %c0_12] : memref<1x256xf32, #tpu.memory_space<vmem>>, vector<1x256xf32>
      %14 = vector.broadcast %13 : vector<1x256xf32> to vector<16x256xf32>
      %15 = arith.addf %12, %14 : vector<16x256xf32>
      %c0_13 = arith.constant 0 : index
      %c0_14 = arith.constant 0 : index
      %16 = vector.load %arg6[%c0_13, %c0_14] : memref<16x256xf32, #tpu.memory_space<vmem>>, vector<16x256xf32>
      tpu.vector_store %arg6[%c0_13, %c0_14], %15 {strides = array<i32>} : memref<16x256xf32, #tpu.memory_space<vmem>>, vector<16x256xf32>,
    } else {
    }
    return
  }
  func.func @transform_0(%arg0: i32, %arg1: i32, %arg2: i32) -> (i32, i32) {
    %c0_i32 = arith.constant 0 : i32
    return %arg0, %arg2 : i32, i32
  }
  func.func @transform_1(%arg0: i32, %arg1: i32, %arg2: i32) -> (i32, i32) {
    %c0_i32 = arith.constant 0 : i32
    return %arg2, %arg1 : i32, i32
  }
  func.func @transform_2(%arg0: i32, %arg1: i32, %arg2: i32) -> (i32, i32) {
    %c0_i32 = arith.constant 0 : i32
    %c0_i32_0 = arith.constant 0 : i32
    return %c0_i32, %arg1 : i32, i32
  }
  func.func @transform_3(%arg0: i32, %arg1: i32, %arg2: i32) -> (i32, i32) {
    %c0_i32 = arith.constant 0 : i32
    return %arg0, %arg1 : i32, i32
  }
}

</mosaic_0001>

<bundles_post_ra>
// kernel: tpu_custom_call.1
= control target key start
LH: loop header
LB: loop body
LE: loop exit
PB: predicated region body
PF: predicated region fallthrough
CT: control target
= control target key end

     0   :  { %s1509_s0 = inlined_call_operand.hbm [shape: f32[48,2048], index: 0, kind: input, shape index: {}]   ;;  %s1510_s1 = inlined_call_operand.hbm [shape: f32[2048,256], index: 1, kind: input, shape index: {}]   ;;  %s1511_s2 = inlined_call_operand.hbm [shape: f32[1,256], index: 2, kind: input, shape index: {}]   ;;  %s1512_s3 = inlined_call_operand.hbm [shape: f32[48,256], index: 3, kind: output, shape index: {}]  }
   0x1   :  { %1535 = sst [smem:[#allocation27_spill]] %s1509_s0 }
   0x2   :  { %1536 = sst [smem:[#allocation28_spill]] %s1511_s2 }
   0x3   :  { %1537 = sst [smem:[#allocation29_spill]] %s1512_s3 }
   0x4   :  { %8 = vsyncpa [#allocation4], 0 }
   0x5   :  { %10 = vsyncpa [#allocation4 + $0x1], 0 }
   0x6   :  { %11 = vsyncpa [#allocation7], 0 }
   0x7   :  { %13 = vsyncpa [#allocation7 + $0x1], 0 }
   0x8   :  { %14 = vsyncpa [#allocation5], 0 }
   0x9   :  { %16 = vsyncpa [#allocation5 + $0x1], 0  ;;  %s1137_s12 = smov 0   ;;  %s1139_s13 = smov 0  }
   0xa   :  { %s1141_s14 = smov 0   ;;  %s1143_s15 = smov 0  }
   0xb   :  { %s1145_s16 = smov 0   ;;  %s1147_s17 = smov 0  }
   0xc   :  { %s1149_s18 = smov 0   ;;  %s1151_s19 = smov 0  }
   0xd   :  { %s1153_s20 = smov 0   ;;  %s1155_s21 = smov 0  }
   0xe   :  { %s1157_s22 = smov 0   ;;  %s1159_s23 = smov 0  }
   0xf   :  { %s1161_s24 = smov 0   ;;  %s1163_s25 = smov 0  }
  0x10 LB: > { %1538 = sst [smem:[#allocation14_spill]] %s1053_s12  ;;  %s1204_s26 = sadd.s32 4294967295, %s1105_s25   ;;  %s1105_s25 = sphi %s1163_s25, %s22_s25   ;;  %s1101_s24 = sphi %s1161_s24, %s1602_s24   ;;  %s1097_s23 = sphi %s1159_s23, %s1601_s23   ;;  %s1093_s22 = sphi %s1157_s22, %s1600_s22   ;;  %s1089_s21 = sphi %s1155_s21, %s1599_s21   ;;  %s1085_s20 = sphi %s1153_s20, %s1598_s20   ;;  %s1081_s19 = sphi %s1151_s19, %s1597_s19   ;;  %s1077_s18 = sphi %s1149_s18, %s1590_s18   ;;  %s1073_s17 = sphi %s1147_s17, %s1596_s17   ;;  %s1069_s16 = sphi %s1145_s16, %s1595_s16   ;;  %s1065_s15 = sphi %s1143_s15, %s1589_s15   ;;  %s1061_s14 = sphi %s1141_s14, %s1594_s14   ;;  %s1057_s13 = sphi %s1139_s13, %s1593_s13   ;;  %s1053_s12 = sphi %s1137_s12, %s1588_s12  }
  0x11   : > { %1539 = sst [smem:[#allocation15_spill]] %s1057_s13  ;;  %s628_s27 = sadd.s32 4294967294, %s1105_s25  }
  0x12   : > { %1540 = sst [smem:[#allocation16_spill]] %s1069_s16  ;;  %p57_p0 = scmp.ne.s32.totalorder %s1085_s20, %s1081_s19 }
  0x13   : > { %1541 = sst [smem:[#allocation17_spill]] %s1081_s19  ;;  %p58_p1 = scmp.eq.s32.totalorder %s1105_s25, 0 }
  0x14   : > { %1542 = sst [smem:[#allocation18_spill]] %s1089_s21  ;;  %p63_p2 = scmp.ne.s32.totalorder %s1081_s19, %s1077_s18 }
  0x15   : > { %1543 = sst [smem:[#allocation19_spill]] %s1093_s22  ;;  %p1513_p3 = scmp.eq.s32.totalorder %s1204_s26, 0 }
  0x16   : > { %1544 = sst [smem:[#allocation20_spill]] %s1204_s26  ;;  %p1214_p4 = por %p58_p1, %p57_p0 }
  0x17   : > { %p85_p5 = scmp.ne.s32.totalorder %s1073_s17, %s1069_s16  ;;  %p1222_p6 = por %p1513_p3, %p63_p2 }
  0x18   : > { %p91_p7 = scmp.ne.s32.totalorder %s1069_s16, %s1065_s15  ;;  %p142_p10 = scmp.ne.s32.totalorder %s1061_s14, %s1057_s13 }
  0x19   : > { %s1546_s4 = scalar_select %p1222_p6, 1, 0 }
  0x1a   : > { %p1227_p8 = por %p85_p5, %p58_p1  ;;  %p1234_p9 = por %p91_p7, %p1513_p3 }
  0x1b   : > { %1547 = sst [smem:[#allocation21_spill]] %s1546_s4  ;;  %p143_p11 = scmp.eq.s32.totalorder %s1204_s26, 23 }
  0x1c   : > { %s1549_s7 = scalar_select %p1234_p9, 1, 0 }
  0x1d   : > { %p148_p12 = scmp.ne.s32.totalorder %s1057_s13, %s1053_s12  ;;  %p149_p13 = scmp.eq.s32.totalorder %s628_s27, 23 }
  0x1e   : > { %1550 = sst [smem:[#allocation22_spill]] %s1549_s7  ;;  %p629_p0 = scmp.ge.s32.totalorder %s1105_s25, 1 }
  0x1f   : > { %p1244_p2 = por %p143_p11, %p142_p10  ;;  %p156_p1 = scmp.lt.s32.totalorder %s1105_s25, 25 }
  0x20   : > { %p1249_p5 = por %p149_p13, %p148_p12  ;;  %s1107_s11 = smov [#allocation8]  }
  0x21   : > { %s1551_s8 = scalar_select %p1244_p2, 1, 0 }
  0x22   : > { %s1553_s9 = scalar_select %p1249_p5, 1, 0 }
  0x23   : > { %1552 = sst [smem:[#allocation23_spill]] %s1551_s8  ;;  %p1253_p7 = pnand %p629_p0, %p156_p1 }
  0x24   : > { %1554 = sst [smem:[#allocation24_spill]] %s1553_s9  ;;  %s172_s15 = sshll.u32 %s1107_s11, 4  ;;  %s173_s15 = int_to_ptr.vmem [resolvable:$true] %s172_s15 }
  0x25   : > { %s1555_s10 = scalar_select %p1253_p7, 1, 0 }
  0x26   : > { %p733_p3 = pneg %p1253_p7  ;;  %p749_p9 = scmp.lt.s32.totalorder %s1105_s25, 24 }
  0x27   : > { %p1556_p10 = scmp.eq.s32.totalorder %s1204_s26, 0  ;;  %s882_s28 = scalar_lea.vmem %s173_s15, 32 }
  0x28   : > { %p1264_p2 = pnand %p749_p9, %p1214_p4  ;;  %p1270_p12 = pnand %p749_p9, %p1227_p8 }
  0x29   : > { %p734_p11 = pnand %p733_p3, %p1556_p10  ;;  %p883_p0 = scmp.ne.s32.totalorder %s173_s15, %s882_s28 }
  0x2a   : > { %p890_p6 = scmp.lt.s32.totalorder %s173_s15, %s173_s15  ;;  %p891_p7 = scmp.lt.s32.totalorder %s882_s28, %s882_s28 }
  0x2b   : > { %p873_p13 = pneg %p734_p11 }
  0x2c   : > { %p892_p3 = por %p891_p7, %p890_p6 }
  0x2d   : > { %p885_p1 = pnand %p883_p0, %p873_p13 }
  0x2f   : > { %p886_p5 = pneg %p885_p1 }
  0x31   : > { %p893_p10 = pnand %p892_p3, %p886_p5 }
  0x33   : > { %896 = shalt.err (!%p893_p10)
}
  0x34   : > { %s1559_s2 = sld [smem:[#allocation28_spill]]  ;;  %s41_s5 = sadd.s32 1, %s1101_s24 }
  0x35   : > { %s34_s6 = sadd.s32 1, %s1097_s23  ;;  %s183_s28 = sand.u32 1, %s1085_s20  }
  0x36   : > { %p35_p4 = scmp.ge.s32.totalorder %s34_s6, 8  ;;  %s632_s29 = sshll.u32 %s183_s28, 5 }
  0x37   : > { %s634_s9 = sshll.u32 %s1097_s23, 1  ;;  %s187_s11 = scalar_lea.vmem [#allocation3], %s632_s29 }
  0x38   : > { %s1604_s6 = smov (%p35_p4, %s34_s6), 0  ;;  %s1606_s5 = smov (!%p35_p4, %s41_s5), %s1101_s24 }
  0x39   : > { %1560 = sst [smem:[#allocation25_spill]] %s1604_s6  ;;  %s46_s30 = ssub.s32 %s1097_s23, %s1604_s6 }
  0x3a   : > { %736 = dma.hbm_to_vmem [thread:$0]  (!%p734_p11), %s1559_s2, 32, %s173_s15, [#allocation7]  }
  0x3b   : > { %p43_p6 = scmp.ge.s32.totalorder %s1606_s5, 3  ;;  %p76_p8 = scmp.eq.s32.totalorder %s46_s30, 0 }
  0x3c   : > { %s654_s15 = sshll.u32 %s1101_s24, 5  ;;  %s197_s2 = sshll.u32 %s187_s11, 4  ;;  %s198_s2 = int_to_ptr.vmem [resolvable:$true] %s197_s2 }
  0x3d   : > { %s1608_s5 = smov (%p43_p6, %s1606_s5), 0  ;;  %s1562_s12 = sadd.s32 1, %s1073_s17 }
  0x3e   : > { %1561 = sst [smem:[#allocation26_spill]] %s1608_s5  ;;  %s45_s8 = ssub.s32 %s1101_s24, %s1608_s5 }
  0x3f   : > { %s1292_s3 = scalar_select %p76_p8, %s1073_s17, %s1562_s12  }
  0x40   : > { %s194_s22 = sadd.s32 %s654_s15, %s634_s9  ;;  %s47_s21 = sor.u32 %s46_s30, %s45_s8 }
  0x41   : > { %p130_p9 = scmp.eq.s32.totalorder %s45_s8, 0  ;;  %p48_p5 = scmp.eq.s32.totalorder %s47_s21, 0 }
  0x42   : > { %s636_s13 = sshll.u32 %s194_s22, 7  ;;  %s1563_s6 = sadd.s32 1, %s1061_s14 }
  0x43   : > { %s1299_s7 = scalar_select %p130_p9, %s1061_s14, %s1563_s6  }
  0x44   : > { %s1564_s16 = sadd.s32 1, %s1085_s20  ;;  %s1565_s0 = sld [smem:[#allocation27_spill]] }
  0x45   : > { %s1304_s26 = scalar_select %p48_p5, %s1085_s20, %s1564_s16  }
  0x46   : > { %s207_s19 = sand.u32 1, %s1105_s25   ;;  %s184_s12 = scalar_lea.sflag [#allocation4], %s183_s28 }
  0x47   : > { %p899_p7 = pneg %p1264_p2  ;;  %s910_s9 = scalar_lea.vmem %s198_s2, 512 }
  0x48   : > { %p911_p11 = scmp.ne.s32.totalorder %s198_s2, %s910_s9  ;;  %s1108_s21 = smov [#allocation3]  }
  0x49   : > { %s915_s22 = sshll.u32 %s1108_s21, 4  ;;  %s916_s22 = int_to_ptr.vmem [resolvable:$false] %s915_s22 }
  0x4a   : > { %s196_s4 = scalar_lea.hbm %s1565_s0, %s636_s13  ;;  %p913_p13 = pnand %p911_p11, %p899_p7 }
  0x4b   : > { %s917_s6 = scalar_lea.vmem %s916_s22, 1024  ;;  %p918_p1 = scmp.lt.s32.totalorder %s198_s2, %s916_s22 }
  0x4c   : > { %p914_p0 = pneg %p913_p13  ;;  %p919_p3 = scmp.lt.s32.totalorder %s917_s6, %s910_s9 }
  0x4e   : > { %p920_p10 = por %p919_p3, %p918_p1 }
  0x50   : > { %p921_p4 = pnand %p920_p10, %p914_p0 }
  0x52   : > { %924 = shalt.err (!%p921_p4)
}
  0x53   : > { %s1109_s16 = smov 2048   ;;  %s1110_s13 = smov 256  }
  0x54   : > { %s1111_s8 = smov 16   ;;  %s209_s28 = sand.u32 1, %s1073_s17  }
  0x55   : > { %740 = dma.hbm_to_vmem [thread:$0]  (!%p1264_p2), %s196_s4, 512, %s198_s2, %s184_s12, %s1109_s16, %s1110_s13, %s1111_s8  }
  0x56   : > { %s637_s30 = sshll.u32 %s209_s28, 9  ;;  %s656_s15 = sshll.u32 %s1097_s23, 13 }
  0x57   : > { %s220_s21 = scalar_lea.hbm %s1510_s1, %s656_s15  ;;  %s211_s9 = scalar_lea.vmem [#allocation6], %s637_s30 }
  0x58   : > { %s221_s22 = sshll.u32 %s211_s9, 4  ;;  %s208_s6 = scalar_lea.sflag [#allocation7], %s207_s19  ;;  %s222_s22 = int_to_ptr.vmem [resolvable:$true] %s221_s22 }
  0x59   : > { %p927_p6 = pneg %p1270_p12  ;;  %s938_s0 = scalar_lea.vmem %s222_s22, 8192 }
  0x5a   : > { %p939_p8 = scmp.ne.s32.totalorder %s222_s22, %s938_s0  ;;  %s1112_s5 = smov [#allocation6]  }
  0x5b   : > { %s943_s18 = sshll.u32 %s1112_s5, 4  ;;  %s944_s18 = int_to_ptr.vmem [resolvable:$false] %s943_s18 }
  0x5c   : > { %p941_p9 = pnand %p939_p8, %p927_p6  ;;  %s945_s2 = scalar_lea.vmem %s944_s18, 16384 }
  0x5d   : > { %p946_p2 = scmp.lt.s32.totalorder %s222_s22, %s944_s18  ;;  %p947_p7 = scmp.lt.s32.totalorder %s945_s2, %s938_s0 }
  0x5e   : > { %p942_p5 = pneg %p941_p9 }
  0x5f   : > { %p948_p11 = por %p947_p7, %p946_p2 }
  0x61   : > { %p949_p13 = pnand %p948_p11, %p942_p5 }
  0x63   : > { %952 = shalt.err (!%p949_p13)
}
  0x64   : > { %743 = dma.hbm_to_vmem [thread:$0]  (!%p1270_p12), %s220_s21, 8192, %s222_s22, %s208_s6, %s1110_s13, %s1110_s13, %s1111_s8  }
  0x65   : > { %p1566_p0 = scmp.ne.s32.totalorder %s1555_s10, 0 }
  0x66   : > { %s1567_s19 = sld [smem:[#allocation17_spill]] (!%p1566_p0) }
  0x67   : > { %233 = sbr.rel (%p1566_p0) target bundleno = 448 (0x1c0), region = 32  ;;  %s1568_s4 = sld [smem:[#allocation21_spill]] (!%p1566_p0) }
  0x6c   : > { %s235_s12 = sand.u32 1, %s1567_s19  }
  0x6d   : > { %s642_s16 = sshll.u32 %s235_s12, 5  ;;  %s236_s28 = scalar_lea.sflag [#allocation4], %s235_s12 }
  0x6e   : > { %s1326_s30 = scalar_lea.vmem [#allocation3], %s642_s16  ;;  %p1569_p1 = scmp.ne.s32.totalorder %s1568_s4, 0 }
  0x70   : > { %1036 = dma.done.wait (%p1569_p1), %s236_s28, 512  }
  0x71   : > { %1038 = vsyncadd (%p1569_p1), %s236_s28, 4294966784  ;;  %s1570_s0 = sld [smem:[#allocation20_spill]] }
  0x72   : > { %s1571_s5 = sld [smem:[#allocation16_spill]] }
  0x73   : > { %s1572_s15 = sld [smem:[#allocation22_spill]] }
  0x77   : > { %s244_s27 = sand.u32 1, %s1570_s0  }
  0x78   : > { %s246_s13 = sand.u32 1, %s1571_s5   ;;  %s245_s10 = scalar_lea.sflag [#allocation7], %s244_s27 }
  0x79   : > { %s643_s8 = sshll.u32 %s246_s13, 9  ;;  %p1573_p12 = scmp.ne.s32.totalorder %s1572_s15, 0 }
  0x7a   : > { %s1334_s29 = scalar_lea.vmem [#allocation6], %s643_s8 }
  0x7b   : > { %1040 = dma.done.wait (%p1573_p12), %s245_s10, 8192  }
  0x7c   : > { %1042 = vsyncadd (%p1573_p12), %s245_s10, 4294959104  ;;  %p1574_p3 = scmp.eq.s32.totalorder %s1570_s0, 0 }
  0x7e   : > { %1044 = dma.done.wait (%p1574_p3), [#allocation7], 32   ;;  %p1575_p10 = pmov %p1574_p3 }
  0x7f   : > { %s1576_s11 = sld [smem:[#allocation15_spill]] }
  0x80   : > { %1046 = vsyncadd (%p1575_p10), [#allocation7], 4294967264  ;;  %s1577_s6 = sld [smem:[#allocation18_spill]] }
  0x85   : > { %s277_s21 = sand.u32 1, %s1576_s11  }
  0x86   : > { %s645_s9 = sshll.u32 %s277_s21, 5  ;;  %p646_p4 = scmp.ne.s32.totalorder %s1577_s6, 0 }
  0x87   : > { %s1347_s22 = scalar_lea.vmem [#allocation9], %s645_s9 }
  0x88   : > { %290 = sbr.rel (%p646_p4) target bundleno = 144 (0x90), region = 48 }
  0x8d   : > { %v1113_v0 = vmov 0.0  }
  0x8e   : > { %291 = vst [vmem:[#allocation2 + $0x10] sm:$0xff] %v1113_v0  ;;  %292 = vst [vmem:[#allocation2] sm:$0xff] %v1113_v0 }
  0x8f   : > { %293 = vst [vmem:[#allocation2 + $0x18] sm:$0xff] %v1113_v0  ;;  %294 = vst [vmem:[#allocation2 + $0x8] sm:$0xff] %v1113_v0 }
  0x90 PF: > { %v334_v1 = vld [vmem:[%s1334_s29 + $0xf8] sm:$0xff]  ;;  %v333_v2 = vld [vmem:[%s1334_s29 + $0xf0] sm:$0xff]  ;;  %v332_v3 = vld [vmem:[%s1334_s29 + $0xe8] sm:$0xff]  ;;  %s1578_s18 = sld [smem:[#allocation18_spill]] }
  0x91   : > { %367 = vmatprep.subr.mxu0 %v334_v1  ;;  %659 = vmatprep.subr.mxu1 %v334_v1  ;;  %v331_v4 = vld [vmem:[%s1334_s29 + $0xe0] sm:$0xff]  ;;  %v330_v5 = vld [vmem:[%s1334_s29 + $0xd8] sm:$0xff]  ;;  %v329_v6 = vld [vmem:[%s1334_s29 + $0xd0] sm:$0xff] }
  0x92   : > { %368 = vmatpush1.msra.mxu0 %v333_v2  ;;  %691 = vmatpush1.msra.mxu1 %v333_v2  ;;  %v328_v7 = vld [vmem:[%s1334_s29 + $0xc8] sm:$0xff]  ;;  %v327_v8 = vld [vmem:[%s1334_s29 + $0xc0] sm:$0xff]  ;;  %v326_v9 = vld [vmem:[%s1334_s29 + $0xb8] sm:$0xff] }
  0x93   : > { %369 = vmatprep.subr.mxu0 %v332_v3  ;;  %660 = vmatprep.subr.mxu1 %v332_v3  ;;  %v325_v10 = vld [vmem:[%s1334_s29 + $0xb0] sm:$0xff]  ;;  %v324_v11 = vld [vmem:[%s1334_s29 + $0xa8] sm:$0xff]  ;;  %v323_v12 = vld [vmem:[%s1334_s29 + $0xa0] sm:$0xff] }
  0x94   : > { %370 = vmatpush1.msra.mxu0 %v331_v4  ;;  %692 = vmatpush1.msra.mxu1 %v331_v4  ;;  %v322_v13 = vld [vmem:[%s1334_s29 + $0x98] sm:$0xff]  ;;  %v321_v14 = vld [vmem:[%s1334_s29 + $0x90] sm:$0xff]  ;;  %v320_v15 = vld [vmem:[%s1334_s29 + $0x88] sm:$0xff] }
  0x95   : > { %371 = vmatprep.subr.mxu0 %v330_v5  ;;  %661 = vmatprep.subr.mxu1 %v330_v5  ;;  %v319_v16 = vld [vmem:[%s1334_s29 + $0x80] sm:$0xff]  ;;  %v318_v17 = vld [vmem:[%s1334_s29 + $0x78] sm:$0xff]  ;;  %v317_v18 = vld [vmem:[%s1334_s29 + $0x70] sm:$0xff] }
  0x96   : > { %372 = vmatpush1.msra.mxu0 %v329_v6  ;;  %693 = vmatpush1.msra.mxu1 %v329_v6  ;;  %v316_v19 = vld [vmem:[%s1334_s29 + $0x68] sm:$0xff]  ;;  %v315_v20 = vld [vmem:[%s1334_s29 + $0x60] sm:$0xff]  ;;  %v314_v21 = vld [vmem:[%s1334_s29 + $0x58] sm:$0xff]  ;;  %p647_p6 = scmp.ne.s32.totalorder %s1578_s18, 7 }
  0x97   : > { %373 = vmatprep.subr.mxu0 %v328_v7  ;;  %662 = vmatprep.subr.mxu1 %v328_v7  ;;  %v313_v22 = vld [vmem:[%s1334_s29 + $0x50] sm:$0xff]  ;;  %v312_v23 = vld [vmem:[%s1334_s29 + $0x48] sm:$0xff]  ;;  %v311_v24 = vld [vmem:[%s1334_s29 + $0x40] sm:$0xff] }
  0x98   : > { %374 = vmatpush1.msra.mxu0 %v327_v8  ;;  %694 = vmatpush1.msra.mxu1 %v327_v8  ;;  %v310_v25 = vld [vmem:[%s1334_s29 + $0x38] sm:$0xff]  ;;  %v309_v26 = vld [vmem:[%s1334_s29 + $0x30] sm:$0xff]  ;;  %v308_v27 = vld [vmem:[%s1334_s29 + $0x28] sm:$0xff] }
  0x99   : > { %375 = vmatprep.subr.mxu0 %v326_v9  ;;  %663 = vmatprep.subr.mxu1 %v326_v9  ;;  %v307_v28 = vld [vmem:[%s1334_s29 + $0x20] sm:$0xff]  ;;  %v306_v29 = vld [vmem:[%s1334_s29 + $0x18] sm:$0xff]  ;;  %v305_v30 = vld [vmem:[%s1334_s29 + $0x10] sm:$0xff] }
  0x9a   : > { %376 = vmatpush1.msra.mxu0 %v325_v10  ;;  %695 = vmatpush1.msra.mxu1 %v325_v10  ;;  %v304_v31 = vld [vmem:[%s1334_s29 + $0x8] sm:$0xff]  ;;  %v303_v32 = vld [vmem:[%s1334_s29] sm:$0xff]  ;;  %v366_v33 = vld [vmem:[%s1334_s29 + $0x1f8] sm:$0xff] }
  0x9b   : > { %377 = vmatprep.subr.mxu0 %v324_v11  ;;  %664 = vmatprep.subr.mxu1 %v324_v11  ;;  %v365_v34 = vld [vmem:[%s1334_s29 + $0x1f0] sm:$0xff]  ;;  %v364_v35 = vld [vmem:[%s1334_s29 + $0x1e8] sm:$0xff]  ;;  %v363_v36 = vld [vmem:[%s1334_s29 + $0x1e0] sm:$0xff] }
  0x9c   : > { %378 = vmatpush1.msra.mxu0 %v323_v12  ;;  %696 = vmatpush1.msra.mxu1 %v323_v12  ;;  %v362_v37 = vld [vmem:[%s1334_s29 + $0x1d8] sm:$0xff]  ;;  %v361_v38 = vld [vmem:[%s1334_s29 + $0x1d0] sm:$0xff]  ;;  %v360_v39 = vld [vmem:[%s1334_s29 + $0x1c8] sm:$0xff] }
  0x9d   : > { %379 = vmatprep.subr.mxu0 %v322_v13  ;;  %665 = vmatprep.subr.mxu1 %v322_v13  ;;  %v359_v40 = vld [vmem:[%s1334_s29 + $0x1c0] sm:$0xff]  ;;  %v358_v41 = vld [vmem:[%s1334_s29 + $0x1b8] sm:$0xff]  ;;  %v357_v42 = vld [vmem:[%s1334_s29 + $0x1b0] sm:$0xff] }
  0x9e   : > { %380 = vmatpush1.msra.mxu0 %v321_v14  ;;  %697 = vmatpush1.msra.mxu1 %v321_v14  ;;  %v356_v43 = vld [vmem:[%s1334_s29 + $0x1a8] sm:$0xff]  ;;  %v355_v44 = vld [vmem:[%s1334_s29 + $0x1a0] sm:$0xff]  ;;  %v354_v45 = vld [vmem:[%s1334_s29 + $0x198] sm:$0xff] }
  0x9f   : > { %381 = vmatprep.subr.mxu0 %v320_v15  ;;  %666 = vmatprep.subr.mxu1 %v320_v15  ;;  %v353_v46 = vld [vmem:[%s1334_s29 + $0x190] sm:$0xff]  ;;  %v352_v47 = vld [vmem:[%s1334_s29 + $0x188] sm:$0xff]  ;;  %v351_v48 = vld [vmem:[%s1334_s29 + $0x180] sm:$0xff] }
  0xa0   : > { %382 = vmatpush1.msra.mxu0 %v319_v16  ;;  %698 = vmatpush1.msra.mxu1 %v319_v16  ;;  %v350_v49 = vld [vmem:[%s1334_s29 + $0x178] sm:$0xff]  ;;  %v349_v50 = vld [vmem:[%s1334_s29 + $0x170] sm:$0xff]  ;;  %v348_v51 = vld [vmem:[%s1334_s29 + $0x168] sm:$0xff] }
  0xa1   : > { %383 = vmatprep.subr.mxu0 %v318_v17  ;;  %667 = vmatprep.subr.mxu1 %v318_v17  ;;  %v347_v52 = vld [vmem:[%s1334_s29 + $0x160] sm:$0xff]  ;;  %v346_v53 = vld [vmem:[%s1334_s29 + $0x158] sm:$0xff]  ;;  %v345_v54 = vld [vmem:[%s1334_s29 + $0x150] sm:$0xff] }
  0xa2   : > { %384 = vmatpush1.msra.mxu0 %v317_v18  ;;  %699 = vmatpush1.msra.mxu1 %v317_v18  ;;  %v344_v55 = vld [vmem:[%s1334_s29 + $0x148] sm:$0xff]  ;;  %v343_v56 = vld [vmem:[%s1334_s29 + $0x140] sm:$0xff]  ;;  %v342_v57 = vld [vmem:[%s1334_s29 + $0x138] sm:$0xff] }
  0xa3   : > { %385 = vmatprep.subr.mxu0 %v316_v19  ;;  %668 = vmatprep.subr.mxu1 %v316_v19  ;;  %v341_v58 = vld [vmem:[%s1334_s29 + $0x130] sm:$0xff]  ;;  %v340_v59 = vld [vmem:[%s1334_s29 + $0x128] sm:$0xff]  ;;  %v339_v60 = vld [vmem:[%s1334_s29 + $0x120] sm:$0xff] }
  0xa4   : > { %386 = vmatpush1.msra.mxu0 %v315_v20  ;;  %700 = vmatpush1.msra.mxu1 %v315_v20  ;;  %v338_v61 = vld [vmem:[%s1334_s29 + $0x118] sm:$0xff]  ;;  %v337_v62 = vld [vmem:[%s1334_s29 + $0x110] sm:$0xff]  ;;  %v336_v63 = vld [vmem:[%s1334_s29 + $0x108] sm:$0xff] }
  0xa5   : > { %387 = vmatprep.subr.mxu0 %v314_v21  ;;  %669 = vmatprep.subr.mxu1 %v314_v21  ;;  %v335_v0 = vld [vmem:[%s1334_s29 + $0x100] sm:$0xff]  ;;  %v300_v1 = vld [vmem:[%s1326_s30 + $0x8] sm:$0xff]  ;;  %v302_v2 = vld [vmem:[%s1326_s30 + $0x18] sm:$0xff] }
  0xa6   : > { %388 = vmatpush1.msra.mxu0 %v313_v22  ;;  %701 = vmatpush1.msra.mxu1 %v313_v22  ;;  %v299_v3 = vld [vmem:[%s1326_s30] sm:$0xff]  ;;  %v301_v4 = vld [vmem:[%s1326_s30 + $0x10] sm:$0xff]  ;;  %v297_v6 = vld [vmem:[#allocation2 + $0x18] sm:$0xff] }
  0xa7   : > { %389 = vmatprep.subr.mxu0 %v312_v23  ;;  %670 = vmatprep.subr.mxu1 %v312_v23  ;;  %v295_v5 = vld [vmem:[#allocation2 + $0x10] sm:$0xff]  ;;  %v296_v9 = vld [vmem:[#allocation2] sm:$0xff]  ;;  %v298_v10 = vld [vmem:[#allocation2 + $0x8] sm:$0xff] }
  0xa8   : > { %390 = vmatpush1.msra.mxu0 %v311_v24  ;;  %702 = vmatpush1.msra.mxu1 %v311_v24 }
  0xa9   : > { %391 = vmatprep.subr.mxu0 %v310_v25  ;;  %671 = vmatprep.subr.mxu1 %v310_v25 }
  0xaa   : > { %392 = vmatpush1.msra.mxu0 %v309_v26  ;;  %703 = vmatpush1.msra.mxu1 %v309_v26 }
  0xab   : > { %393 = vmatprep.subr.mxu0 %v308_v27  ;;  %672 = vmatprep.subr.mxu1 %v308_v27 }
  0xac   : > { %394 = vmatpush1.msra.mxu0 %v307_v28  ;;  %704 = vmatpush1.msra.mxu1 %v307_v28 }
  0xad   : > { %395 = vmatprep.subr.mxu0 %v306_v29  ;;  %673 = vmatprep.subr.mxu1 %v306_v29 }
  0xae   : > { %396 = vmatpush1.msra.mxu0 %v305_v30  ;;  %705 = vmatpush1.msra.mxu1 %v305_v30 }
  0xaf   : > { %397 = vmatprep.subr.mxu0 %v304_v31  ;;  %674 = vmatprep.subr.mxu1 %v304_v31 }
  0xb0   : > { %398 = vmatpush1.msra.mxu0 %v303_v32  ;;  %706 = vmatpush1.msra.mxu1 %v303_v32 }
  0xb1   : > { %399 = vmatprep.subr.mxu0 %v366_v33  ;;  %675 = vmatprep.subr.mxu1 %v366_v33 }
  0xb2   : > { %400 = vmatpush2.msra.mxu0 %v365_v34  ;;  %707 = vmatpush2.msra.mxu1 %v365_v34 }
  0xb3   : > { %401 = vmatprep.subr.mxu0 %v364_v35  ;;  %676 = vmatprep.subr.mxu1 %v364_v35 }
  0xb4   : > { %402 = vmatpush2.msra.mxu0 %v363_v36  ;;  %708 = vmatpush2.msra.mxu1 %v363_v36 }
  0xb5   : > { %403 = vmatprep.subr.mxu0 %v362_v37  ;;  %677 = vmatprep.subr.mxu1 %v362_v37 }
  0xb6   : > { %404 = vmatpush2.msra.mxu0 %v361_v38  ;;  %709 = vmatpush2.msra.mxu1 %v361_v38 }
  0xb7   : > { %405 = vmatprep.subr.mxu0 %v360_v39  ;;  %678 = vmatprep.subr.mxu1 %v360_v39 }
  0xb8   : > { %406 = vmatpush2.msra.mxu0 %v359_v40  ;;  %710 = vmatpush2.msra.mxu1 %v359_v40 }
  0xb9   : > { %407 = vmatprep.subr.mxu0 %v358_v41  ;;  %679 = vmatprep.subr.mxu1 %v358_v41 }
  0xba   : > { %408 = vmatpush2.msra.mxu0 %v357_v42  ;;  %711 = vmatpush2.msra.mxu1 %v357_v42 }
  0xbb   : > { %409 = vmatprep.subr.mxu0 %v356_v43  ;;  %680 = vmatprep.subr.mxu1 %v356_v43 }
  0xbc   : > { %410 = vmatpush2.msra.mxu0 %v355_v44  ;;  %712 = vmatpush2.msra.mxu1 %v355_v44 }
  0xbd   : > { %411 = vmatprep.subr.mxu0 %v354_v45  ;;  %681 = vmatprep.subr.mxu1 %v354_v45 }
  0xbe   : > { %412 = vmatpush2.msra.mxu0 %v353_v46  ;;  %713 = vmatpush2.msra.mxu1 %v353_v46 }
  0xbf   : > { %413 = vmatprep.subr.mxu0 %v352_v47  ;;  %682 = vmatprep.subr.mxu1 %v352_v47 }
  0xc0   : > { %414 = vmatpush2.msra.mxu0 %v351_v48  ;;  %714 = vmatpush2.msra.mxu1 %v351_v48 }
  0xc1   : > { %415 = vmatprep.subr.mxu0 %v350_v49  ;;  %683 = vmatprep.subr.mxu1 %v350_v49 }
  0xc2   : > { %416 = vmatpush2.msra.mxu0 %v349_v50  ;;  %715 = vmatpush2.msra.mxu1 %v349_v50 }
  0xc3   : > { %417 = vmatprep.subr.mxu0 %v348_v51  ;;  %684 = vmatprep.subr.mxu1 %v348_v51 }
  0xc4   : > { %418 = vmatpush2.msra.mxu0 %v347_v52  ;;  %716 = vmatpush2.msra.mxu1 %v347_v52 }
  0xc5   : > { %419 = vmatprep.subr.mxu0 %v346_v53  ;;  %685 = vmatprep.subr.mxu1 %v346_v53 }
  0xc6   : > { %420 = vmatpush2.msra.mxu0 %v345_v54  ;;  %717 = vmatpush2.msra.mxu1 %v345_v54 }
  0xc7   : > { %421 = vmatprep.subr.mxu0 %v344_v55  ;;  %686 = vmatprep.subr.mxu1 %v344_v55 }
  0xc8   : > { %422 = vmatpush2.msra.mxu0 %v343_v56  ;;  %718 = vmatpush2.msra.mxu1 %v343_v56 }
  0xc9   : > { %423 = vmatprep.subr.mxu0 %v342_v57  ;;  %687 = vmatprep.subr.mxu1 %v342_v57 }
  0xca   : > { %424 = vmatpush2.msra.mxu0 %v341_v58  ;;  %719 = vmatpush2.msra.mxu1 %v341_v58 }
  0xcb   : > { %425 = vmatprep.subr.mxu0 %v340_v59  ;;  %688 = vmatprep.subr.mxu1 %v340_v59 }
  0xcc   : > { %426 = vmatpush2.msra.mxu0 %v339_v60  ;;  %720 = vmatpush2.msra.mxu1 %v339_v60 }
  0xcd   : > { %427 = vmatprep.subr.mxu0 %v338_v61  ;;  %689 = vmatprep.subr.mxu1 %v338_v61 }
  0xce   : > { %428 = vmatpush2.msra.mxu0 %v337_v62  ;;  %721 = vmatpush2.msra.mxu1 %v337_v62 }
  0xcf   : > { %429 = vmatprep.subr.mxu0 %v336_v63  ;;  %690 = vmatprep.subr.mxu1 %v336_v63 }
  0xd0   : > { %430 = vmatpush2.msra.mxu0 %v335_v0  ;;  %722 = vmatpush2.msra.mxu1 %v335_v0 }
  0xd1   : > { %431 = vmatprep.mubr.f32.mxu0 %v300_v1  ;;  %437 = vmatprep.mubr.f32.mxu1 %v302_v2 }
  0xd2   : > { %432 = vmatmul.mubr.f32.vlgmr.msra.gmra.mxu0 %v299_v3  ;;  %438 = vmatmul.mubr.f32.vlgmr.msra.gmra.mxu1 %v301_v4 }
 0x192   : > { %v433_v7 = vpop.f32.mrf.mxu0  ;;  %v439_v8 = vpop.f32.mrf.mxu1 }
 0x193   : > { %v444_v11 = vadd.f32 %v433_v7, %v295_v5  ;;  %v446_v12 = vadd.f32 %v439_v8, %v297_v6  ;;  %455 = sbr.rel (%p647_p6) target bundleno = 420 (0x1a4), region = 52 }
 0x194   : > { %v435_v13 = vpop.f32.mrf.mxu0  ;;  %v441_v14 = vpop.f32.mrf.mxu1 }
 0x195   : > { %448 = vst [vmem:[#allocation2 + $0x10] sm:$0xff] %v444_v11  ;;  %450 = vst [vmem:[#allocation2 + $0x18] sm:$0xff] %v446_v12  ;;  %v445_v15 = vadd.f32 %v435_v13, %v296_v9  ;;  %v447_v16 = vadd.f32 %v441_v14, %v298_v10 }
 0x197   : > { %449 = vst [vmem:[#allocation2] sm:$0xff] %v445_v15  ;;  %451 = vst [vmem:[#allocation2 + $0x8] sm:$0xff] %v447_v16 }
 0x198   : > { %v462_v17 = vlaneseq  ;;  %v460_v19 = vld [vmem:[#allocation8] sm:$0x3] }
 0x19a   : > { %v463_v18 = vshrl.u32 %v462_v17, 7 }
 0x19c   : > { %v456_v20 = vld [vmem:[#allocation2 + $0x10] sm:$0xff]  ;;  %v464_v21 = vsub.s32 0, %v463_v18  ;;  %v468_v22 = vsub.s32 1, %v463_v18  ;;  %v458_v24 = vld [vmem:[#allocation2 + $0x18] sm:$0xff] }
 0x19e   : > { %v457_v23 = vld [vmem:[#allocation2] sm:$0xff]  ;;  %v459_v25 = vld [vmem:[#allocation2 + $0x8] sm:$0xff]  ;;  %v465_v26 = vrot.slane %v460_v19, %v464_v21  ;;  %v469_v27 = vrot.slane %v460_v19, %v468_v22 }
 0x1a0   : > { %v472_v28 = vadd.f32 %v465_v26, %v456_v20  ;;  %v473_v29 = vadd.f32 %v469_v27, %v457_v23  ;;  %v474_v30 = vadd.f32 %v465_v26, %v458_v24  ;;  %v475_v31 = vadd.f32 %v469_v27, %v459_v25 }
 0x1a2   : > { %476 = vst [vmem:[%s1347_s22] sm:$0xff] %v472_v28  ;;  %477 = vst [vmem:[%s1347_s22 + $0x8] sm:$0xff] %v473_v29 }
 0x1a3   : > { %478 = vst [vmem:[%s1347_s22 + $0x10] sm:$0xff] %v474_v30  ;;  %479 = vst [vmem:[%s1347_s22 + $0x18] sm:$0xff] %v475_v31 }
 0x1a4 PF: > { %s1579_s2 = sld [smem:[#allocation19_spill]]  ;;  %s497_s5 = sshll.u32 %s1347_s22, 4  ;;  %s1430_s5 = int_to_ptr.vmem [resolvable:$true] %s497_s5 }
 0x1a5   : > { %s1581_s4 = sld [smem:[#allocation23_spill]]  ;;  %s1434_s15 = scalar_lea.sflag [#allocation5], %s277_s21 }
 0x1a6   : > { %s1582_s30 = sld [smem:[#allocation29_spill]]  ;;  %s953_s27 = scalar_lea.vmem %s1430_s5, 512 }
 0x1a7   : > { %p954_p8 = scmp.ne.s32.totalorder %s1430_s5, %s953_s27  ;;  %s1114_s13 = smov [#allocation9]  }
 0x1a8   : > { %s957_s8 = sshll.u32 %s1114_s13, 4  ;;  %s958_s8 = int_to_ptr.vmem [resolvable:$false] %s957_s8 }
 0x1a9   : > { %s959_s10 = scalar_lea.vmem %s958_s8, 1024  ;;  %p960_p7 = scmp.lt.s32.totalorder %s1430_s5, %s958_s8 }
 0x1aa   : > { %s658_s12 = sshll.u32 %s1579_s2, 9  ;;  %p961_p11 = scmp.lt.s32.totalorder %s959_s10, %s953_s27 }
 0x1ab   : > { %p1583_p9 = scmp.ne.s32.totalorder %s1581_s4, 0 }
 0x1ac   : > { %s1427_s0 = scalar_lea.hbm %s1582_s30, %s658_s12  ;;  %p962_p13 = por %p961_p11, %p960_p7 }
 0x1ad   : > { %p955_p5 = pnand %p954_p8, %p1583_p9 }
 0x1af   : > { %p956_p2 = pneg %p955_p5 }
 0x1b1   : > { %p963_p0 = pnand %p962_p13, %p956_p2 }
 0x1b3   : > { %966 = shalt.err (!%p963_p0)
}
 0x1b4   : > { %s967_s29 = scalar_lea.hbm %s1427_s0, 512  ;;  %s971_s9 = scalar_lea.hbm %s1582_s30, 1536 }
 0x1b5   : > { %p968_p1 = scmp.ne.s32.totalorder %s1427_s0, %s967_s29  ;;  %p972_p10 = scmp.lt.s32.totalorder %s1427_s0, %s1582_s30 }
 0x1b6   : > { %p973_p4 = scmp.lt.s32.totalorder %s971_s9, %s967_s29 }
 0x1b7   : > { %p969_p12 = pnand %p968_p1, %p1583_p9 }
 0x1b8   : > { %p974_p6 = por %p973_p4, %p972_p10 }
 0x1b9   : > { %p970_p3 = pneg %p969_p12 }
 0x1bb   : > { %p975_p8 = pnand %p974_p6, %p970_p3 }
 0x1bd   : > { %978 = shalt.err (!%p975_p8)
}
 0x1be   : > { %s1115_s18 = smov 256   ;;  %s1116_s2 = smov 16  }
 0x1bf   : > { %731 = dma.vmem_to_hbm [thread:$0]  (%p1583_p9), %s1430_s5, 512, %s1427_s0, %s1434_s15, %s1115_s18, %s1115_s18, %s1116_s2  }
 0x1c0 PF: > { %s1584_s19 = sld [smem:[#allocation14_spill]]  ;;  %p751_p5 = scmp.ge.s32.totalorder %s1105_s25, 2 }
 0x1c1   : > { %s1585_s12 = sld [smem:[#allocation24_spill]] }
 0x1c6   : > { %s512_s16 = sand.u32 1, %s1584_s19  }
 0x1c7   : > { %p1586_p2 = scmp.ne.s32.totalorder %s1585_s12, 0  ;;  %s513_s28 = scalar_lea.sflag [#allocation5], %s512_s16 }
 0x1c9   : > { %p745_p7 = pnand %p751_p5, %p1586_p2 }
 0x1cb   : > { %p746_p11 = pneg %p745_p7 }
 0x1cd   : > { %1048 = dma.done.wait (%p746_p11), %s513_s28, 512  }
 0x1ce   : > { %1050 = vsyncadd (%p746_p11), %s513_s28, 4294966784  ;;  %s22_s25 = sadd.s32 1, %s1105_s25   ;;  %s1588_s12 = sld [smem:[#allocation15_spill]] }
 0x1cf   : > { %p1462_p13 = scmp.ge.s32.totalorder %s22_s25, 26   ;;  %s1589_s15 = sld [smem:[#allocation16_spill]] }
 0x1d0   : > { %s1590_s18 = sld [smem:[#allocation17_spill]]  ;;  %s1593_s13 = smov %s1061_s14 }
 0x1d1   : > { %s1591_s4 = sld [smem:[#allocation25_spill]]  ;;  %s1594_s14 = smov %s1299_s7 }
 0x1d2   : > { %s1592_s0 = sld [smem:[#allocation26_spill]]  ;;  %s1595_s16 = smov %s1073_s17 }
 0x1d3   : > { %s1596_s17 = smov %s1292_s3  ;;  %s1597_s19 = smov %s1085_s20 }
 0x1d4   : > { %s1598_s20 = smov %s1304_s26  ;;  %s1599_s21 = smov %s1097_s23 }
 0x1d5   : > { %s1600_s22 = smov %s1101_s24  ;;  %21 = sbr.rel (!%p1462_p13) target bundleno = 16 (0x10), region = 103 }
 0x1d7   : > { %s1601_s23 = smov %s1591_s4 }
 0x1d8   : > { %s1602_s24 = smov %s1592_s0 }
 0x1da   :  { %518 = vsyncpa [#allocation4], 1 }
 0x1db   :  { %520 = vsyncpa [#allocation4 + $0x1], 1 }
 0x1dc   :  { %521 = vsyncpa [#allocation7], 1 }
 0x1dd   :  { %523 = vsyncpa [#allocation7 + $0x1], 1 }
 0x1de   :  { %524 = vsyncpa [#allocation5], 1 }
 0x1df   :  { %526 = vsyncpa [#allocation5 + $0x1], 1 }

</bundles_post_ra>
